<compile_context>
chip_gen: v6e
topology: v6e:2x2x1
jax: 0.10.0
libtpu: 0.0.40
codegen_flags: <defaults>
</compile_context>

<pallas_src>
import jax
import jax.numpy as jnp
from jax.experimental import pallas as pl
from jax.experimental.pallas import tpu as pltpu

FEATURES = 7        # ['Make', 'Year', 'Engine HP', 'Engine Cylinders',
                    #  'Transmission Type', 'Driven_Wheels', 'Number of Doors']
FEAT_PAD = 8        # sublane-aligned feature axis (zero-padded, no effect on math)
H1 = 128
H2 = 64
OUT = 1


def _round_up(x, m):
    return ((x + m - 1) // m) * m


def mlp_kernel(x_ref, w1_ref, b1_ref, w2_ref, b2_ref, w3_ref, b3_ref, o_ref):
    # x tile: (FEAT_PAD, TB) -- batch on lanes.  Weights are tiny and VMEM-resident.
    x = x_ref[...]                                                          # (8, TB)
    h1 = jnp.dot(w1_ref[...], x, preferred_element_type=jnp.float32) + b1_ref[...]
    h1 = jnp.maximum(h1, 0.0)                                               # (128, TB)
    h2 = jnp.dot(w2_ref[...], h1, preferred_element_type=jnp.float32) + b2_ref[...]
    h2 = jnp.maximum(h2, 0.0)                                               # (64, TB)
    y = jnp.dot(w3_ref[...], h2, preferred_element_type=jnp.float32) + b3_ref[...]
    o_ref[...] = y.astype(o_ref.dtype)                                      # (1, TB)


def car_price_forward(x, params, *, tb=4096):
    """x: (B, FEATURES) f32; params in PyTorch layout (w: (out,in), b: (out,1))."""
    w1, b1, w2, b2, w3, b3 = params
    B = x.shape[0]

    # Batch tile on the lane axis: multiple of 128, capped so tiny batches use 1 tile.
    tb = max(128, min(_round_up(tb, 128), _round_up(B, 128)))
    b_pad = _round_up(B, tb)
    grid = (b_pad // tb,)

    # Feature-major, lane-dense, sublane-aligned input slab (8, b_pad);
    # zero-pad the extra feature row and the extra batch lanes.
    xt = jnp.zeros((FEAT_PAD, b_pad), x.dtype).at[:FEATURES, :B].set(x.T)
    # W1 gets a matching zero column so the padded feature row contributes nothing.
    w1p = jnp.zeros((H1, FEAT_PAD), w1.dtype).at[:, :FEATURES].set(w1)

    flops = 2 * b_pad * (FEAT_PAD * H1 + H1 * H2 + H2 * OUT)
    bytes_accessed = 4 * (
        FEAT_PAD * b_pad + OUT * b_pad
        + H1 * FEAT_PAD + H1 + H2 * H1 + H2 + OUT * H2 + OUT
    )

    const = lambda i: (0, 0)  # weights/biases: same block every step -> VMEM-resident
    out_t = pl.pallas_call(
        mlp_kernel,
        out_shape=jax.ShapeDtypeStruct((OUT, b_pad), jnp.float32),
        grid=grid,
        in_specs=[
            pl.BlockSpec((FEAT_PAD, tb), lambda i: (0, i)),   # streamed x tiles
            pl.BlockSpec((H1, FEAT_PAD), const),              # w1 (128, 8)
            pl.BlockSpec((H1, 1), const),                     # b1 (128, 1)
            pl.BlockSpec((H2, H1), const),                    # w2 (64, 128)
            pl.BlockSpec((H2, 1), const),                     # b2 (64, 1)
            pl.BlockSpec((OUT, H2), const),                   # w3 (1, 64)
            pl.BlockSpec((OUT, 1), const),                    # b3 (1, 1)
        ],
        out_specs=pl.BlockSpec((OUT, tb), lambda i: (0, i)),  # lane-dense (1, TB)
        compiler_params=pltpu.CompilerParams(
            dimension_semantics=("parallel",)),               # shard batch tiles on v7x 2-TC
        cost_estimate=pl.CostEstimate(
            flops=flops, transcendentals=0, bytes_accessed=bytes_accessed),
    )(xt, w1p, b1, w2, b2, w3, b3)

    return out_t[:, :B].T  # back to (B, 1)


def init_params(key):
    """Deterministic init mimicking torch.nn.Linear defaults, in PyTorch layout."""
    ks = jax.random.split(key, 6)

    def linear(kw, kb, fan_in, fan_out):
        bound = 1.0 / jnp.sqrt(jnp.float32(fan_in))
        w = jax.random.uniform(kw, (fan_out, fan_in), jnp.float32, -bound, bound)
        b = jax.random.uniform(kb, (fan_out, 1), jnp.float32, -bound, bound)
        return w, b

    w1, b1 = linear(ks[0], ks[1], FEATURES, H1)
    w2, b2 = linear(ks[2], ks[3], H1, H2)
    w3, b3 = linear(ks[4], ks[5], H2, OUT)
    return (w1, b1, w2, b2, w3, b3)


if __name__ == "__main__":
    key = jax.random.PRNGKey(0)
    k_x, k_p = jax.random.split(key)

    # Small, non-tile-aligned batch to exercise padding + a multi-step grid.
    B = 300
    x = jax.random.normal(k_x, (B, FEATURES), dtype=jnp.float32)
    params = init_params(k_p)

    out = car_price_forward(x, params, tb=128)   # grid = (3,) batch tiles
    jax.block_until_ready(out)

    # sanity: pure-JAX reference (PyTorch semantics: x @ W.T + b)
    w1, b1, w2, b2, w3, b3 = params
    ref = jnp.maximum(x @ w1.T + b1.T, 0.0)
    ref = jnp.maximum(ref @ w2.T + b2.T, 0.0)
    ref = ref @ w3.T + b3.T
    assert out.shape == (B, OUT)
    assert jnp.allclose(out, ref, atol=1e-4, rtol=1e-4)

    print("KERNEL_OK")
</pallas_src>

<mosaic_0001>
module attributes {stable_mosaic.version = 11 : i64} {
  func.func @mlp_kernel(%arg0: i32, %arg1: memref<8x128xf32, #tpu.memory_space<vmem>>, %arg2: memref<128x8xf32, #tpu.memory_space<vmem>>, %arg3: memref<128x1xf32, #tpu.memory_space<vmem>>, %arg4: memref<64x128xf32, #tpu.memory_space<vmem>>, %arg5: memref<64x1xf32, #tpu.memory_space<vmem>>, %arg6: memref<1x64xf32, #tpu.memory_space<vmem>>, %arg7: memref<1x1xf32, #tpu.memory_space<vmem>>, %arg8: memref<1x128xf32, #tpu.memory_space<vmem>>) attributes {dimension_semantics = [#tpu.dimension_semantics<parallel>], iteration_bounds = array<i64: 3>, scalar_prefetch = 0 : i64, scratch_operands = 0 : i64, tpu.core_type = #tpu.core_type<tc>, window_params = [{transform_indices = @transform_0, window_bounds = array<i64: 8, 128>}, {pipeline_mode = #tpu.pipeline_mode<synchronous>, transform_indices = @transform_1, window_bounds = array<i64: 128, 8>}, {pipeline_mode = #tpu.pipeline_mode<synchronous>, transform_indices = @transform_2, window_bounds = array<i64: 128, 1>}, {pipeline_mode = #tpu.pipeline_mode<synchronous>, transform_indices = @transform_3, window_bounds = array<i64: 64, 128>}, {pipeline_mode = #tpu.pipeline_mode<synchronous>, transform_indices = @transform_4, window_bounds = array<i64: 64, 1>}, {pipeline_mode = #tpu.pipeline_mode<synchronous>, transform_indices = @transform_5, window_bounds = array<i64: 1, 64>}, {pipeline_mode = #tpu.pipeline_mode<synchronous>, transform_indices = @transform_6, window_bounds = array<i64: 1, 1>}, {transform_indices = @transform_7, window_bounds = array<i64: 1, 128>}]} {
    %c0 = arith.constant 0 : index
    %c0_0 = arith.constant 0 : index
    %0 = vector.load %arg1[%c0, %c0_0] : memref<8x128xf32, #tpu.memory_space<vmem>>, vector<8x128xf32>
    %c0_1 = arith.constant 0 : index
    %c0_2 = arith.constant 0 : index
    %1 = vector.load %arg2[%c0_1, %c0_2] : memref<128x8xf32, #tpu.memory_space<vmem>>, vector<128x8xf32>
    %cst = arith.constant dense<0.000000e+00> : vector<128x128xf32>
    %2 = tpu.matmul %1, %0, %cst {dimension_numbers = #tpu.dot_dimension_numbers<[1], [0], [0], [1], [0, 0, 1, 1], [], []>} : vector<128x8xf32>, vector<8x128xf32>, vector<128x128xf32> -> vector<128x128xf32>
    %c0_3 = arith.constant 0 : index
    %c0_4 = arith.constant 0 : index
    %3 = vector.load %arg3[%c0_3, %c0_4] : memref<128x1xf32, #tpu.memory_space<vmem>>, vector<128x1xf32>
    %4 = vector.broadcast %3 : vector<128x1xf32> to vector<128x128xf32>
    %5 = arith.addf %2, %4 : vector<128x128xf32>
    %cst_5 = arith.constant 0.000000e+00 : f32
    %6 = vector.broadcast %cst_5 : f32 to vector<128x128xf32>
    %7 = arith.maximumf %5, %6 : vector<128x128xf32>
    %c0_6 = arith.constant 0 : index
    %c0_7 = arith.constant 0 : index
    %8 = vector.load %arg4[%c0_6, %c0_7] : memref<64x128xf32, #tpu.memory_space<vmem>>, vector<64x128xf32>
    %cst_8 = arith.constant dense<0.000000e+00> : vector<64x128xf32>
    %9 = tpu.matmul %8, %7, %cst_8 {dimension_numbers = #tpu.dot_dimension_numbers<[1], [0], [0], [1], [0, 0, 1, 1], [], []>} : vector<64x128xf32>, vector<128x128xf32>, vector<64x128xf32> -> vector<64x128xf32>
    %c0_9 = arith.constant 0 : index
    %c0_10 = arith.constant 0 : index
    %10 = vector.load %arg5[%c0_9, %c0_10] : memref<64x1xf32, #tpu.memory_space<vmem>>, vector<64x1xf32>
    %11 = vector.broadcast %10 : vector<64x1xf32> to vector<64x128xf32>
    %12 = arith.addf %9, %11 : vector<64x128xf32>
    %cst_11 = arith.constant 0.000000e+00 : f32
    %13 = vector.broadcast %cst_11 : f32 to vector<64x128xf32>
    %14 = arith.maximumf %12, %13 : vector<64x128xf32>
    %c0_12 = arith.constant 0 : index
    %c0_13 = arith.constant 0 : index
    %15 = vector.load %arg6[%c0_12, %c0_13] : memref<1x64xf32, #tpu.memory_space<vmem>>, vector<1x64xf32>
    %cst_14 = arith.constant dense<0.000000e+00> : vector<1x128xf32>
    %16 = tpu.matmul %15, %14, %cst_14 {dimension_numbers = #tpu.dot_dimension_numbers<[1], [0], [0], [1], [0, 0, 1, 1], [], []>} : vector<1x64xf32>, vector<64x128xf32>, vector<1x128xf32> -> vector<1x128xf32>
    %c0_15 = arith.constant 0 : index
    %c0_16 = arith.constant 0 : index
    %17 = vector.load %arg7[%c0_15, %c0_16] : memref<1x1xf32, #tpu.memory_space<vmem>>, vector<1x1xf32>
    %18 = vector.broadcast %17 : vector<1x1xf32> to vector<1x128xf32>
    %19 = arith.addf %16, %18 : vector<1x128xf32>
    %c0_17 = arith.constant 0 : index
    %c0_18 = arith.constant 0 : index
    %20 = vector.load %arg8[%c0_17, %c0_18] : memref<1x128xf32, #tpu.memory_space<vmem>>, vector<1x128xf32>
    tpu.vector_store %arg8[%c0_17, %c0_18], %19 {strides = array<i32>} : memref<1x128xf32, #tpu.memory_space<vmem>>, vector<1x128xf32>,
    return
  }
  func.func @transform_0(%arg0: i32) -> (i32, i32) {
    %c0_i32 = arith.constant 0 : i32
    %c0_i32_0 = arith.constant 0 : i32
    return %c0_i32, %arg0 : i32, i32
  }
  func.func @transform_1(%arg0: i32) -> (i32, i32) {
    %c0_i32 = arith.constant 0 : i32
    %c0_i32_0 = arith.constant 0 : i32
    %c0_i32_1 = arith.constant 0 : i32
    return %c0_i32, %c0_i32_0 : i32, i32
  }
  func.func @transform_2(%arg0: i32) -> (i32, i32) {
    %c0_i32 = arith.constant 0 : i32
    %c0_i32_0 = arith.constant 0 : i32
    %c0_i32_1 = arith.constant 0 : i32
    return %c0_i32, %c0_i32_0 : i32, i32
  }
  func.func @transform_3(%arg0: i32) -> (i32, i32) {
    %c0_i32 = arith.constant 0 : i32
    %c0_i32_0 = arith.constant 0 : i32
    %c0_i32_1 = arith.constant 0 : i32
    return %c0_i32, %c0_i32_0 : i32, i32
  }
  func.func @transform_4(%arg0: i32) -> (i32, i32) {
    %c0_i32 = arith.constant 0 : i32
    %c0_i32_0 = arith.constant 0 : i32
    %c0_i32_1 = arith.constant 0 : i32
    return %c0_i32, %c0_i32_0 : i32, i32
  }
  func.func @transform_5(%arg0: i32) -> (i32, i32) {
    %c0_i32 = arith.constant 0 : i32
    %c0_i32_0 = arith.constant 0 : i32
    %c0_i32_1 = arith.constant 0 : i32
    return %c0_i32, %c0_i32_0 : i32, i32
  }
  func.func @transform_6(%arg0: i32) -> (i32, i32) {
    %c0_i32 = arith.constant 0 : i32
    %c0_i32_0 = arith.constant 0 : i32
    %c0_i32_1 = arith.constant 0 : i32
    return %c0_i32, %c0_i32_0 : i32, i32
  }
  func.func @transform_7(%arg0: i32) -> (i32, i32) {
    %c0_i32 = arith.constant 0 : i32
    %c0_i32_0 = arith.constant 0 : i32
    return %c0_i32, %arg0 : i32, i32
  }
}

</mosaic_0001>

<bundles_post_ra>
// kernel: tpu_custom_call.1
= control target key start
LH: loop header
LB: loop body
LE: loop exit
PB: predicated region body
PF: predicated region fallthrough
CT: control target
= control target key end

     0   :  { %s1506_s0 = inlined_call_operand.vmem [shape: f32[8,384], index: 0, kind: input, shape index: {}]   ;;  %s1507_s1 = inlined_call_operand.vmem [shape: f32[128,8], index: 1, kind: input, shape index: {}]   ;;  %s1508_s2 = inlined_call_operand.vmem [shape: f32[128,1], index: 2, kind: input, shape index: {}]   ;;  %s1509_s3 = inlined_call_operand.vmem [shape: f32[64,128], index: 3, kind: input, shape index: {}]   ;;  %s1510_s4 = inlined_call_operand.vmem [shape: f32[64,1], index: 4, kind: input, shape index: {}]   ;;  %s1511_s5 = inlined_call_operand.vmem [shape: f32[1,64], index: 5, kind: input, shape index: {}]   ;;  %s1512_s6 = inlined_call_operand.<no memory space> [shape: f32[1,1], index: 6, kind: input, shape index: {}]   ;;  %s1513_s7 = inlined_call_operand.hbm [shape: f32[1,384], index: 7, kind: output, shape index: {}]  }
   0x1   :  { %v12_v0 = vstv %s1512_s6 }
   0x2   :  { %13 = vst [vmem:[#allocation2] sm:$0x1] %v12_v0 }
   0x3   :  { %14 = vsyncpa [#allocation4], 0 }
   0x4   :  { %16 = vsyncpa [#allocation4 + $0x1], 0  ;;  %s1238_s26 = smov 0   ;;  %s1240_s27 = smov 0  }
   0x5   :  { %s1242_s28 = smov 0   ;;  %s1244_s29 = smov 0  }
   0x6 LB: > { %s1259_s6 = sadd.s32 4294967295, %s1189_s29   ;;  %s921_s30 = sadd.s32 4294967294, %s1189_s29   ;;  %s1189_s29 = sphi %s1244_s29, %s1519_s29   ;;  %s1185_s28 = sphi %s1242_s28, %s1518_s28   ;;  %s1181_s27 = sphi %s1240_s27, %s1517_s27   ;;  %s1177_s26 = sphi %s1238_s26, %s1516_s26  }
   0x7   : > { %s1263_s8 = sadd.s32 1, %s1189_s29   ;;  %s181_s9 = sadd.s32 1, %s1185_s28 }
   0x8   : > { %s178_s10 = ssub.s32 %s1189_s29, %s1263_s8  ;;  %p191_p0 = scmp.ne.s32.totalorder %s1185_s28, %s1181_s27 }
   0x9   : > { %p179_p1 = scmp.eq.s32.totalorder %s178_s10, 0  ;;  %p192_p2 = scmp.eq.s32.totalorder %s1259_s6, 2 }
   0xa   : > { %p197_p3 = scmp.ne.s32.totalorder %s1181_s27, %s1177_s26  ;;  %p198_p4 = scmp.eq.s32.totalorder %s921_s30, 2 }
   0xb   : > { %s1274_s11 = scalar_select %p179_p1, %s1185_s28, %s181_s9  }
   0xc   : > { %p1276_p5 = por %p192_p2, %p191_p0  ;;  %p1280_p6 = por %p198_p4, %p197_p3 }
   0xd   : > { %p924_p7 = scmp.ge.s32.totalorder %s1189_s29, 1  ;;  %p241_p8 = scmp.lt.s32.totalorder %s1189_s29, 4 }
   0xf   : > { %p242_p9 = pnand %p924_p7, %p241_p8 }
  0x10   : > { %p271_p10 = scmp.lt.s32.totalorder (!%p242_p9), %s1259_s6, 2  ;;  %s269_s9 = sand.u32 (!%p242_p9), 1, %s1181_s27  }
  0x11   : > { %245 = sbr.rel (%p242_p9) target bundleno = 718 (0x2ce), region = 48  ;;  %s943_s10 = sshll.u32 (!%p242_p9), %s1259_s6, 4 }
  0x12   : > { %s270_s14 = scalar_lea.vmem (!%p242_p9), [#allocation3], %s269_s9  ;;  %s1471_s18 = scalar_lea.hbm (!%p242_p9), %s1513_s7, %s943_s10 }
  0x13   : > { %s866_s15 = sshll.u32 (!%p242_p9), %s270_s14, 4  ;;  %s854_s19 = scalar_lea.sflag (!%p242_p9), [#allocation4], %s269_s9  ;;  %s867_s15 = int_to_ptr.vmem [resolvable:$true] %s866_s15 }
  0x16   : > { %v276_v1 = vld [vmem:[%s1507_s1] sm:$0xff]  ;;  %vm388_vm0 = vcmask 64512   ;;  %v1191_v2 = vmov 0   ;;  %s272_s16 = scalar_select %p271_p10, %s1259_s6, 2  ;;  %v307_v3 = vld [vmem:[%s1508_s2 + $0x78] sm:$0xff]  ;;  %v305_v4 = vld [vmem:[%s1508_s2 + $0x68] sm:$0xff] }
  0x17   : > { %998 = vmatprep.mubr.msk.f32.mxu0 %vm388_vm0, %v276_v1  ;;  %1127 = vset.pattern.permute.xlu0 %v1191_v2  ;;  %v277_v6 = vld [vmem:[%s1507_s1 + $0x8] sm:$0xff]  ;;  %v278_v7 = vld [vmem:[%s1507_s1 + $0x10] sm:$0xff]  ;;  %v304_v9 = vld [vmem:[%s1508_s2 + $0x60] sm:$0xff]  ;;  %vm1193_vm1 = vmmov 0   ;;  %vm778_vm2 = vcmask 523264   ;;  %s1194_s6 = smov [#allocation3]  }
  0x18   : > { %1128 = vset.pattern.permute.xlu1 %v1191_v2  ;;  %s925_s17 = sshll.u32 %s272_s16, 3  ;;  %385 = vperm.xlu0 %1127, %v307_v3   ;;  %v306_v8 = vld [vmem:[%s1508_s2 + $0x70] sm:$0xff]  ;;  %v279_v10 = vld [vmem:[%s1507_s1 + $0x18] sm:$0xff]  ;;  %v280_v11 = vld [vmem:[%s1507_s1 + $0x20] sm:$0xff]  ;;  %s1133_s21 = sshll.u32 %s1194_s6, 4  ;;  %s1134_s21 = int_to_ptr.vmem [resolvable:$false] %s1133_s21 }
  0x19   : > { %s274_s20 = scalar_lea.vmem %s1506_s0, %s925_s17  ;;  %375 = vperm.xlu1 %1128, %v305_v4   ;;  %v303_v12 = vld [vmem:[%s1508_s2 + $0x58] sm:$0xff]  ;;  %v302_v13 = vld [vmem:[%s1508_s2 + $0x50] sm:$0xff]  ;;  %v281_v14 = vld [vmem:[%s1507_s1 + $0x28] sm:$0xff]  ;;  %s1135_s22 = scalar_lea.vmem %s1134_s21, 32 }
  0x1a   : > { %v275_v5 = vld [vmem:[%s274_s20] sm:$0xff]  ;;  %v282_v15 = vld [vmem:[%s1507_s1 + $0x30] sm:$0xff]  ;;  %v301_v16 = vld [vmem:[%s1508_s2 + $0x48] sm:$0xff]  ;;  %s1129_s20 = scalar_lea.vmem %s867_s15, 16  ;;  %p1136_p0 = scmp.lt.s32.totalorder %s867_s15, %s1134_s21 }
  0x1b   : > { %996 = vmatprep.subr.mxu0 %v275_v5  ;;  %v300_v17 = vld [vmem:[%s1508_s2 + $0x40] sm:$0xff]  ;;  %v283_v18 = vld [vmem:[%s1507_s1 + $0x38] sm:$0xff]  ;;  %v298_v21 = vld [vmem:[%s1508_s2 + $0x30] sm:$0xff]  ;;  %p1130_p11 = scmp.ne.s32.totalorder %s867_s15, %s1129_s20  ;;  %p1137_p1 = scmp.lt.s32.totalorder %s1135_s22, %s1129_s20 }
  0x1c   : > { %997 = vmatpush3.msra.mxu0 %v275_v5  ;;  %380 = vperm.xlu0 %1127, %v306_v8   ;;  %v284_v19 = vld [vmem:[%s1507_s1 + $0x40] sm:$0xff]  ;;  %v299_v20 = vld [vmem:[%s1508_s2 + $0x38] sm:$0xff]  ;;  %v285_v22 = vld [vmem:[%s1507_s1 + $0x48] sm:$0xff] }
  0x1d   : > { %999 = vmatmul.mubr.msk.f32.vlgmr.msra.gmra.mxu0 %vm388_vm0, %v277_v6  ;;  %370 = vperm.xlu1 %1128, %v304_v9   ;;  %v286_v23 = vld [vmem:[%s1507_s1 + $0x50] sm:$0xff]  ;;  %v297_v24 = vld [vmem:[%s1508_s2 + $0x28] sm:$0xff]  ;;  %v296_v25 = vld [vmem:[%s1508_s2 + $0x20] sm:$0xff]  ;;  %p1131_p12 = pnand %p1130_p11, %p1276_p5  ;;  %p1138_p2 = por %p1137_p1, %p1136_p0 }
  0x1e   : > { %1001 = vmatprep.mubr.msk.f32.mxu0 %vm388_vm0, %v278_v7  ;;  %v287_v26 = vld [vmem:[%s1507_s1 + $0x58] sm:$0xff]  ;;  %v288_v27 = vld [vmem:[%s1507_s1 + $0x60] sm:$0xff]  ;;  %v294_v29 = vld [vmem:[%s1508_s2 + $0x10] sm:$0xff] }
  0x1f   : > { %v295_v28 = vld [vmem:[%s1508_s2 + $0x18] sm:$0xff]  ;;  %v289_v30 = vld [vmem:[%s1507_s1 + $0x68] sm:$0xff]  ;;  %v290_v31 = vld [vmem:[%s1507_s1 + $0x70] sm:$0xff]  ;;  %p1132_p13 = pneg %p1131_p12 }
  0x20   : > { %365 = vperm.xlu0 %1127, %v303_v12   ;;  %v293_v32 = vld [vmem:[%s1508_s2 + $0x8] sm:$0xff]  ;;  %v292_v33 = vld [vmem:[%s1508_s2] sm:$0xff]  ;;  %v291_v34 = vld [vmem:[%s1507_s1 + $0x78] sm:$0xff] }
  0x21   : > { %1002 = vmatmul.mubr.msk.f32.gmra.mxu0 %vm388_vm0, %v279_v10  ;;  %360 = vperm.xlu1 %1128, %v302_v13   ;;  %v613_v35 = vld [vmem:[%s1510_s4 + $0x38] sm:$0xff]  ;;  %v612_v36 = vld [vmem:[%s1510_s4 + $0x30] sm:$0xff]  ;;  %v611_v37 = vld [vmem:[%s1510_s4 + $0x28] sm:$0xff]  ;;  %p1139_p3 = pnand %p1138_p2, %p1132_p13 }
  0x22   : > { %1004 = vmatprep.mubr.msk.f32.mxu0 %vm388_vm0, %v280_v11  ;;  %v610_v38 = vld [vmem:[%s1510_s4 + $0x20] sm:$0xff]  ;;  %v609_v39 = vld [vmem:[%s1510_s4 + $0x18] sm:$0xff]  ;;  %v608_v40 = vld [vmem:[%s1510_s4 + $0x10] sm:$0xff] }
  0x23   : > { %v607_v41 = vld [vmem:[%s1510_s4 + $0x8] sm:$0xff]  ;;  %v606_v42 = vld [vmem:[%s1510_s4] sm:$0xff] }
  0x24   : > { %355 = vperm.xlu0 %1127, %v301_v16   ;;  %v768_v43 = vld [vmem:[#allocation2] sm:$0x1] }
  0x25   : > { %1005 = vmatmul.mubr.msk.f32.gmra.mxu0 %vm388_vm0, %v281_v14  ;;  %350 = vperm.xlu1 %1128, %v300_v17   ;;  %v598_v44 = vld [vmem:[%s1509_s3] sm:$0xff] }
  0x26   : > { %1007 = vmatprep.mubr.msk.f32.mxu0 %vm388_vm0, %v282_v15  ;;  %1054 = vmatprep.mubr.f32.mxu1 %v598_v44 }
  0x28   : > { %345 = vperm.xlu0 %1127, %v299_v20  }
  0x29   : > { %1008 = vmatmul.mubr.msk.f32.gmra.mxu0 %vm388_vm0, %v283_v18  ;;  %340 = vperm.xlu1 %1128, %v298_v21  }
  0x2a   : > { %1010 = vmatprep.mubr.msk.f32.mxu0 %vm388_vm0, %v284_v19 }
  0x2c   : > { %335 = vperm.xlu0 %1127, %v297_v24  }
  0x2d   : > { %1011 = vmatmul.mubr.msk.f32.gmra.mxu0 %vm388_vm0, %v285_v22  ;;  %330 = vperm.xlu1 %1128, %v296_v25  }
  0x2e   : > { %1013 = vmatprep.mubr.msk.f32.mxu0 %vm388_vm0, %v286_v23 }
  0x30   : > { %325 = vperm.xlu0 %1127, %v295_v28  }
  0x31   : > { %1014 = vmatmul.mubr.msk.f32.gmra.mxu0 %vm388_vm0, %v287_v26  ;;  %320 = vperm.xlu1 %1128, %v294_v29  }
  0x32   : > { %1016 = vmatprep.mubr.msk.f32.mxu0 %vm388_vm0, %v288_v27 }
  0x34   : > { %315 = vperm.xlu0 %1127, %v293_v32  }
  0x35   : > { %1017 = vmatmul.mubr.msk.f32.gmra.mxu0 %vm388_vm0, %v289_v30  ;;  %310 = vperm.xlu1 %1128, %v292_v33  }
  0x36   : > { %1019 = vmatprep.mubr.msk.f32.mxu0 %vm388_vm0, %v290_v31 }
  0x38   : > { %651 = vperm.xlu0 %1127, %v613_v35  }
  0x39   : > { %1020 = vmatmul.mubr.msk.f32.gmra.mxu0 %vm388_vm0, %v291_v34  ;;  %646 = vperm.xlu1 %1128, %v612_v36  }
  0x3c   : > { %641 = vperm.xlu0 %1127, %v611_v37  }
  0x3d   : > { %636 = vperm.xlu1 %1128, %v610_v38  }
  0x40   : > { %631 = vperm.xlu0 %1127, %v609_v39  }
  0x41   : > { %626 = vperm.xlu1 %1128, %v608_v40  }
  0x44   : > { %621 = vperm.xlu0 %1127, %v607_v41  }
  0x45   : > { %616 = vperm.xlu1 %1128, %v606_v42  }
  0x48   : > { %771 = vperm.xlu0 %1127, %v768_v43  }
  0x93   : > { %v386_v50 = vpop.permute.xlu0 %385 }
  0x94   : > { %v376_v52 = vpop.permute.xlu1 %375 }
  0x97   : > { %v381_v55 = vpop.permute.xlu0 %380 }
  0x98   : > { %v371_v57 = vpop.permute.xlu1 %370 }
  0x9b   : > { %v366_v60 = vpop.permute.xlu0 %365 }
  0x9c   : > { %v361_v62 = vpop.permute.xlu1 %360 }
  0x9f   : > { %v356_v1 = vpop.permute.xlu0 %355 }
  0xa0   : > { %v351_v4 = vpop.permute.xlu1 %350 }
  0xa3   : > { %v346_v11 = vpop.permute.xlu0 %345 }
  0xa4   : > { %v341_v14 = vpop.permute.xlu1 %340 }
  0xa7   : > { %v336_v19 = vpop.permute.xlu0 %335 }
  0xa8   : > { %v331_v22 = vpop.permute.xlu1 %330 }
  0xab   : > { %v326_v27 = vpop.permute.xlu0 %325 }
  0xac   : > { %v321_v30 = vpop.permute.xlu1 %320 }
  0xaf   : > { %v316_v35 = vpop.permute.xlu0 %315 }
  0xb0   : > { %v311_v38 = vpop.permute.xlu1 %310 }
  0xdd   : > { %v1430_v45 = vpop.f32.mrf.mxu0 }
  0xde   : > { %v509_v39 = vadd.f32 %v1430_v45, %v316_v35  ;;  %v600_v45 = vld [vmem:[%s1509_s3 + $0x10] sm:$0xff] }
  0xdf   : > { %v1432_v46 = vpop.f32.mrf.mxu0 }
  0xe0   : > { %v504_v41 = vadd.f32 %v1432_v46, %v311_v38  ;;  %v583_v43 = vmax.f32 %v509_v39, 0.0  ;;  %v601_v46 = vld [vmem:[%s1509_s3 + $0x18] sm:$0xff] }
  0xe1   : > { %v1434_v47 = vpop.f32.mrf.mxu0 }
  0xe2   : > { %v519_v33 = vadd.f32 %v1434_v47, %v326_v27  ;;  %v582_v44 = vmax.f32 %v504_v41, 0.0  ;;  %v599_v47 = vld [vmem:[%s1509_s3 + $0x8] sm:$0xff] }
  0xe3   : > { %v1436_v48 = vpop.f32.mrf.mxu0 }
  0xe4   : > { %v514_v36 = vadd.f32 %v1436_v48, %v321_v30  ;;  %v585_v40 = vmax.f32 %v519_v33, 0.0  ;;  %v602_v48 = vld [vmem:[%s1509_s3 + $0x20] sm:$0xff] }
  0xe5   : > { %v1006_v49 = vpop.f32.mrf.mxu0 }
  0xe6   : > { %v529_v28 = vadd.f32 %v1006_v49, %v336_v19  ;;  %v584_v42 = vmax.f32 %v514_v36, 0.0  ;;  %v603_v49 = vld [vmem:[%s1509_s3 + $0x28] sm:$0xff] }
  0xe7   : > { %v523_v51 = vpop.f32.mrf.mxu0 }
  0xe8   : > { %v524_v31 = vadd.f32 %v523_v51, %v331_v22  ;;  %v587_v34 = vmax.f32 %v529_v28, 0.0  ;;  %v605_v51 = vld [vmem:[%s1509_s3 + $0x38] sm:$0xff]  ;;  %v774_v22 = vlaneseq }
  0xe9   : > { %v1009_v53 = vpop.f32.mrf.mxu0 }
  0xea   : > { %v539_v23 = vadd.f32 %v1009_v53, %v346_v11  ;;  %v586_v37 = vmax.f32 %v524_v31, 0.0 }
  0xeb   : > { %v533_v54 = vpop.f32.mrf.mxu0 }
  0xec   : > { %v534_v25 = vadd.f32 %v533_v54, %v341_v14  ;;  %v589_v29 = vmax.f32 %v539_v23, 0.0  ;;  %v775_v23 = vshrl.u32 %v774_v22, 7 }
  0xed   : > { %v1012_v56 = vpop.f32.mrf.mxu0 }
  0xee   : > { %v549_v17 = vadd.f32 %v1012_v56, %v356_v1  ;;  %v588_v32 = vmax.f32 %v534_v25, 0.0 }
  0xef   : > { %v543_v58 = vpop.f32.mrf.mxu0 }
  0xf0   : > { %v544_v20 = vadd.f32 %v543_v58, %v351_v4  ;;  %v591_v24 = vmax.f32 %v549_v17, 0.0 }
  0xf1   : > { %v1015_v59 = vpop.f32.mrf.mxu0 }
  0xf2   : > { %v559_v12 = vadd.f32 %v1015_v59, %v366_v60  ;;  %v590_v26 = vmax.f32 %v544_v20, 0.0 }
  0xf3   : > { %v553_v61 = vpop.f32.mrf.mxu0 }
  0xf4   : > { %v554_v15 = vadd.f32 %v553_v61, %v361_v62  ;;  %v593_v18 = vmax.f32 %v559_v12, 0.0 }
  0xf5   : > { %v1018_v63 = vpop.f32.mrf.mxu0 }
  0xf6   : > { %v569_v6 = vadd.f32 %v1018_v63, %v376_v52  ;;  %v592_v21 = vmax.f32 %v554_v15, 0.0  ;;  %v1192_v52 = vmov 0.0  }
  0xf7   : > { %v563_v0 = vpop.f32.mrf.mxu0  ;;  %1066 = vmatprep.subr.mxu0 %v1192_v52  ;;  %1082 = vmatprep.mubr.msk.f32.mxu0 %vm1193_vm1, %v1192_v52 }
  0xf8   : > { %v564_v9 = vadd.f32 %v563_v0, %v371_v57  ;;  %v595_v13 = vmax.f32 %v569_v6, 0.0  ;;  %v647_v57 = vpop.permute.xlu1 %646 }
  0xf9   : > { %v1021_v2 = vpop.f32.mrf.mxu0 }
  0xfa   : > { %v579_v3 = vadd.f32 %v1021_v2, %v386_v50  ;;  %v594_v16 = vmax.f32 %v564_v9, 0.0  ;;  %v604_v50 = vld [vmem:[%s1509_s3 + $0x30] sm:$0xff] }
  0xfb   : > { %v573_v5 = vpop.f32.mrf.mxu0 }
  0xfc   : > { %v597_v7 = vmax.f32 %v579_v3, 0.0  ;;  %v574_v8 = vadd.f32 %v573_v5, %v381_v55  ;;  %v652_v55 = vpop.permute.xlu0 %651  ;;  %v637_v62 = vpop.permute.xlu1 %636 }
  0xfe   : > { %v596_v10 = vmax.f32 %v574_v8, 0.0  ;;  %1022 = vmatprep.subr.mxu1 %v597_v7 }
  0xff   : > { %1023 = vmatpush3.msra.mxu1 %v597_v7 }
 0x100   : > { %1024 = vmatprep.subr.mxu1 %v596_v10  ;;  %v642_v60 = vpop.permute.xlu0 %641  ;;  %v627_v8 = vpop.permute.xlu1 %626 }
 0x101   : > { %1025 = vmatpush3.msra.mxu1 %v596_v10 }
 0x102   : > { %1026 = vmatprep.subr.mxu1 %v595_v13 }
 0x103   : > { %1027 = vmatpush3.msra.mxu1 %v595_v13 }
 0x104   : > { %1028 = vmatprep.subr.mxu1 %v594_v16  ;;  %v632_v5 = vpop.permute.xlu0 %631 }
 0x105   : > { %1029 = vmatpush3.msra.mxu1 %v594_v16  ;;  %v617_v16 = vpop.permute.xlu1 %616 }
 0x106   : > { %1030 = vmatprep.subr.mxu1 %v593_v18 }
 0x107   : > { %1031 = vmatpush3.msra.mxu1 %v593_v18 }
 0x108   : > { %1032 = vmatprep.subr.mxu1 %v592_v21  ;;  %v622_v13 = vpop.permute.xlu0 %621 }
 0x109   : > { %1033 = vmatpush3.msra.mxu1 %v592_v21  ;;  %v767_v21 = vld [vmem:[%s1511_s5] sm:$0x1] }
 0x10a   : > { %1034 = vmatprep.subr.mxu1 %v591_v24 }
 0x10b   : > { %1035 = vmatpush3.msra.mxu1 %v591_v24  ;;  %v776_v24 = vsub.s32 0, %v775_v23 }
 0x10c   : > { %1036 = vmatprep.subr.mxu1 %v590_v26  ;;  %v772_v25 = vpop.permute.xlu0 %771 }
 0x10d   : > { %1037 = vmatpush3.msra.mxu1 %v590_v26  ;;  %v777_v26 = vrot.slane %v772_v25, %v776_v24 }
 0x10e   : > { %1038 = vmatprep.subr.mxu1 %v589_v29 }
 0x10f   : > { %1039 = vmatpush3.msra.mxu1 %v589_v29 }
 0x110   : > { %1040 = vmatprep.subr.mxu1 %v588_v32 }
 0x111   : > { %1041 = vmatpush3.msra.mxu1 %v588_v32 }
 0x112   : > { %1042 = vmatprep.subr.mxu1 %v587_v34 }
 0x113   : > { %1043 = vmatpush3.msra.mxu1 %v587_v34 }
 0x114   : > { %1044 = vmatprep.subr.mxu1 %v586_v37 }
 0x115   : > { %1045 = vmatpush3.msra.mxu1 %v586_v37 }
 0x116   : > { %1046 = vmatprep.subr.mxu1 %v585_v40 }
 0x117   : > { %1047 = vmatpush3.msra.mxu1 %v585_v40 }
 0x118   : > { %1048 = vmatprep.subr.mxu1 %v584_v42 }
 0x119   : > { %1049 = vmatpush3.msra.mxu1 %v584_v42 }
 0x11a   : > { %1050 = vmatprep.subr.mxu1 %v583_v43 }
 0x11b   : > { %1051 = vmatpush3.msra.mxu1 %v583_v43 }
 0x11c   : > { %1052 = vmatprep.subr.mxu1 %v582_v44 }
 0x11d   : > { %1053 = vmatpush3.msra.mxu1 %v582_v44 }
 0x11e   : > { %1055 = vmatmul.mubr.f32.vlgmr.msra.gmra.mxu1 %v599_v47 }
 0x11f   : > { %1057 = vmatprep.mubr.f32.mxu1 %v600_v45 }
 0x122   : > { %1058 = vmatmul.mubr.f32.gmra.mxu1 %v601_v46 }
 0x123   : > { %1060 = vmatprep.mubr.f32.mxu1 %v602_v48 }
 0x126   : > { %1061 = vmatmul.mubr.f32.gmra.mxu1 %v603_v49 }
 0x127   : > { %1063 = vmatprep.mubr.f32.mxu1 %v604_v50 }
 0x12a   : > { %1064 = vmatmul.mubr.f32.gmra.mxu1 %v605_v51 }
 0x1de   : > { %v1056_v53 = vpop.f32.mrf.mxu1 }
 0x1df   : > { %v726_v14 = vadd.f32 %v1056_v53, %v622_v13 }
 0x1e0   : > { %v720_v54 = vpop.f32.mrf.mxu1 }
 0x1e1   : > { %v721_v17 = vadd.f32 %v720_v54, %v617_v16  ;;  %v760_v19 = vmax.f32 %v726_v14, 0.0 }
 0x1e2   : > { %v1059_v56 = vpop.f32.mrf.mxu1 }
 0x1e3   : > { %v736_v9 = vadd.f32 %v1059_v56, %v632_v5  ;;  %v759_v20 = vmax.f32 %v721_v17, 0.0 }
 0x1e4   : > { %v730_v58 = vpop.f32.mrf.mxu1 }
 0x1e5   : > { %v731_v11 = vadd.f32 %v730_v58, %v627_v8  ;;  %v762_v15 = vmax.f32 %v736_v9, 0.0 }
 0x1e6   : > { %v1062_v59 = vpop.f32.mrf.mxu1 }
 0x1e7   : > { %v746_v2 = vadd.f32 %v1062_v59, %v642_v60  ;;  %v761_v18 = vmax.f32 %v731_v11, 0.0 }
 0x1e8   : > { %v740_v61 = vpop.f32.mrf.mxu1 }
 0x1e9   : > { %v741_v6 = vadd.f32 %v740_v61, %v637_v62  ;;  %v764_v10 = vmax.f32 %v746_v2, 0.0 }
 0x1ea   : > { %v1065_v63 = vpop.f32.mrf.mxu1 }
 0x1eb   : > { %v756_v0 = vadd.f32 %v1065_v63, %v652_v55  ;;  %v763_v12 = vmax.f32 %v741_v6, 0.0 }
 0x1ec   : > { %v750_v1 = vpop.f32.mrf.mxu1 }
 0x1ed   : > { %v766_v3 = vmax.f32 %v756_v0, 0.0  ;;  %v751_v4 = vadd.f32 %v750_v1, %v647_v57 }
 0x1ef   : > { %v765_v7 = vmax.f32 %v751_v4, 0.0  ;;  %1067 = vmatpush3.msra.mxu0 %v766_v3 }
 0x1f0   : > { %1068 = vmatprep.subr.mxu0 %v1192_v52 }
 0x1f1   : > { %1069 = vmatpush3.msra.mxu0 %v765_v7 }
 0x1f2   : > { %1070 = vmatprep.subr.mxu0 %v1192_v52 }
 0x1f3   : > { %1071 = vmatpush3.msra.mxu0 %v764_v10 }
 0x1f4   : > { %1072 = vmatprep.subr.mxu0 %v1192_v52 }
 0x1f5   : > { %1073 = vmatpush3.msra.mxu0 %v763_v12 }
 0x1f6   : > { %1074 = vmatprep.subr.mxu0 %v1192_v52 }
 0x1f7   : > { %1075 = vmatpush3.msra.mxu0 %v762_v15 }
 0x1f8   : > { %1076 = vmatprep.subr.mxu0 %v1192_v52 }
 0x1f9   : > { %1077 = vmatpush3.msra.mxu0 %v761_v18 }
 0x1fa   : > { %1078 = vmatprep.subr.mxu0 %v1192_v52 }
 0x1fb   : > { %1079 = vmatpush3.msra.mxu0 %v760_v19 }
 0x1fc   : > { %1080 = vmatprep.subr.mxu0 %v1192_v52 }
 0x1fd   : > { %1081 = vmatpush3.msra.mxu0 %v759_v20 }
 0x1fe   : > { %1083 = vmatmul.mubr.msk.f32.vlgmr.msra.gmra.mxu0 %vm778_vm2, %v767_v21 }
 0x2be   : > { %v848_v27 = vpop.f32.mrf.mxu0 }
 0x2bf   : > { %v849_v28 = vadd.f32 %v848_v27, %v777_v26 }
 0x2c0   : > { %v1084_v29 = vpop.f32.mrf.mxu0 }
 0x2c1   : > { %852 = vst [vmem:[%s270_s14] sm:$0x1] %v849_v28 }
 0x2c2   : > { %1142 = shalt.err (!%p1139_p3)
}
 0x2c3   : > { %s1143_s23 = scalar_lea.hbm %s1471_s18, 16  ;;  %s1147_s30 = scalar_lea.hbm %s1513_s7, 48 }
 0x2c4   : > { %p1144_p4 = scmp.ne.s32.totalorder %s1471_s18, %s1143_s23  ;;  %p1148_p9 = scmp.lt.s32.totalorder %s1471_s18, %s1513_s7 }
 0x2c5   : > { %p1149_p10 = scmp.lt.s32.totalorder %s1147_s30, %s1143_s23 }
 0x2c6   : > { %p1145_p7 = pnand %p1144_p4, %p1276_p5 }
 0x2c7   : > { %p1150_p11 = por %p1149_p10, %p1148_p9 }
 0x2c8   : > { %p1146_p8 = pneg %p1145_p7 }
 0x2ca   : > { %p1151_p12 = pnand %p1150_p11, %p1146_p8 }
 0x2cc   : > { %1154 = shalt.err (!%p1151_p12)
}
 0x2cd   : > { %1085 = dma.vmem_to_hbm [thread:$0]  (%p1276_p5), %s867_s15, 16, %s1471_s18, %s854_s19  }
 0x2ce PF: > { %p1091_p13 = scmp.ge.s32.totalorder %s1189_s29, 2  ;;  %s878_s14 = sand.u32 1, %s1177_s26  }
 0x2cf   : > { %s879_s16 = scalar_lea.sflag [#allocation4], %s878_s14 }
 0x2d0   : > { %p1088_p0 = pnand %p1091_p13, %p1280_p6 }
 0x2d2   : > { %p1089_p1 = pneg %p1088_p0 }
 0x2d4   : > { %1172 = dma.done.wait (%p1089_p1), %s879_s16, 16  }
 0x2d5   : > { %1174 = vsyncadd (%p1089_p1), %s879_s16, 4294967280  ;;  %p19_p2 = scmp.ge.s32.totalorder %s1263_s8, 5   ;;  %s1516_s26 = smov %s1181_s27 }
 0x2d6   : > { %s1517_s27 = smov %s1185_s28  ;;  %s1518_s28 = smov %s1274_s11 }
 0x2d7   : > { %s1519_s29 = smov %s1263_s8  ;;  %21 = sbr.rel (!%p19_p2) target bundleno = 6 (0x6), region = 83 }
 0x2dc   :  { %883 = vsyncpa [#allocation4], 1 }
 0x2dd   :  { %885 = vsyncpa [#allocation4 + $0x1], 1 }

</bundles_post_ra>
